<compile_context>
chip_gen: v5e
topology: v5e:2x2
jax: 0.10.0
libtpu: 0.0.40
codegen_flags: <defaults>
</compile_context>

<pallas_src>
import math
import functools

import jax
import jax.numpy as jnp
from jax.experimental import pallas as pl
from jax.experimental.pallas import tpu as pltpu


def _round_up(v, m):
    return ((v + m - 1) // m) * m


# ---------------------------------------------------------------------------
# Fused kernel: grid = (num_layers,)
#   step 0       : h = h0 = relu(x @ W_fc0 + b_fc0)
#   every step l : GraphConvolution(variant=True, residual=False) + ReLU  (see header)
#   last step    : out = log_softmax(h @ W_fc1 + b_fc1)   (class dim lane-padded)
# ---------------------------------------------------------------------------
def _gcnii_fused_kernel(scal_ref,                                    # SMEM [1+L] f32: [alpha, theta_1..theta_L]
                        x_ref, adj_ref, fc0_w_ref, fc0_b_ref,        # VMEM inputs
                        w_ref, fc1_w_ref, fc1_b_ref,
                        o_ref,                                       # VMEM output [N, CP] f32
                        h_ref, h0_ref,                               # VMEM scratch [N, H] f32
                        *, n_classes):
    l = pl.program_id(0)
    num_layers = pl.num_programs(0)

    # ---- first grid step: input projection + ReLU ----
    @pl.when(l == 0)
    def _():
        y = jnp.dot(x_ref[...], fc0_w_ref[...], preferred_element_type=jnp.float32)
        y = jnp.maximum(y + fc0_b_ref[...], 0.0)
        h_ref[...] = y
        h0_ref[...] = y

    alpha = scal_ref[0]
    theta = scal_ref[1 + l]          # theta of PyTorch layer index (l+1)
    h0 = h0_ref[...]

    # ---------------- GraphConvolution.forward (variant=True, residual=False) -------------
    # hi = torch.spmm(adj, input)  -> dense adj @ h on the MXU (bf16 in, f32 accumulate)
    hi = jnp.dot(adj_ref[...], h_ref[...].astype(jnp.bfloat16),
                 preferred_element_type=jnp.float32)

    # support = cat([hi, h0], 1); single K = 2H contraction on the MXU
    support = jnp.concatenate([hi, h0], axis=1).astype(jnp.bfloat16)
    sw = jnp.dot(support, w_ref[...], preferred_element_type=jnp.float32)

    # r = (1-alpha)*hi + alpha*h0 ; output = theta * support @ W + (1-theta) * r  (f32)
    r = (1.0 - alpha) * hi + alpha * h0
    out_l = theta * sw + (1.0 - theta) * r
    # ---------------------------------------------------------------------------------------

    # GCNII per-layer ReLU; h stays resident in VMEM for the next grid step
    h_ref[...] = jnp.maximum(out_l, 0.0)

    # ---- last grid step: output projection + log_softmax (lane-padded classes) ----
    @pl.when(l == num_layers - 1)
    def _():
        y = jnp.dot(h_ref[...].astype(jnp.bfloat16), fc1_w_ref[...],
                    preferred_element_type=jnp.float32)
        y = y + fc1_b_ref[...]
        col = jax.lax.broadcasted_iota(jnp.int32, y.shape, 1)
        y = jnp.where(col < n_classes, y, -jnp.inf)        # mask padded class lanes
        m = jnp.max(y, axis=1, keepdims=True)
        e = jnp.exp(y - m)
        lse = jnp.log(jnp.sum(e, axis=1, keepdims=True)) + m
        o_ref[...] = jnp.where(col < n_classes, y - lse, 0.0)


# ---------------------------------------------------------------------------
# Full GCNII forward (single pallas_call)
# ---------------------------------------------------------------------------
def gcnii_forward(x, edge_index, params, *, alpha=0.1, lamda=0.5):
    N, F_in = x.shape
    H = params["fc0_w"].shape[1]
    C = params["fc1_w"].shape[1]
    L = len(params["conv_ws"])
    CP = _round_up(C, 128)                      # lane-dense output store

    # to_dense_adj(edge_index).squeeze(): plain-JAX glue (scatter-add of ones).
    # Raw adjacency, no self-loops / normalization — mirrors what GraphConvolution.forward
    # receives in the reference harness.
    adj = jnp.zeros((N, N), jnp.float32).at[edge_index[0], edge_index[1]].add(1.0)

    # bf16 copies for the MXU (adj is exact in bf16: small integer edge counts).
    adj_bf = adj.astype(jnp.bfloat16)
    x_bf = x.astype(jnp.bfloat16)
    fc0_w = params["fc0_w"].astype(jnp.bfloat16)
    fc0_b = params["fc0_b"].reshape(1, H).astype(jnp.float32)
    conv_w = jnp.stack(params["conv_ws"], axis=0).astype(jnp.bfloat16)      # [L, 2H, H]
    fc1_w = jnp.zeros((H, CP), jnp.bfloat16).at[:, :C].set(
        params["fc1_w"].astype(jnp.bfloat16))
    fc1_b = jnp.zeros((1, CP), jnp.float32).at[0, :C].set(
        params["fc1_b"].astype(jnp.float32))

    # Scalar-prefetch SMEM vector: [alpha, theta_1 .. theta_L]  (theta_l = log(lamda/l + 1)).
    # Keeping alpha in SMEM (not baked in) means a single compile covers any (alpha, lamda).
    thetas = jnp.log(lamda / jnp.arange(1, L + 1, dtype=jnp.float32) + 1.0)
    scal = jnp.concatenate([jnp.full((1,), alpha, jnp.float32), thetas])

    kern = functools.partial(_gcnii_fused_kernel, n_classes=C)

    out_padded = pl.pallas_call(
        kern,
        out_shape=jax.ShapeDtypeStruct((N, CP), jnp.float32),
        grid_spec=pltpu.PrefetchScalarGridSpec(
            num_scalar_prefetch=1,
            grid=(L,),
            in_specs=[
                pl.BlockSpec((N, F_in), lambda l, s: (0, 0)),            # x
                pl.BlockSpec((N, N), lambda l, s: (0, 0)),               # adj (VMEM-resident)
                pl.BlockSpec((F_in, H), lambda l, s: (0, 0)),            # fc0 weight
                pl.BlockSpec((1, H), lambda l, s: (0, 0)),               # fc0 bias
                pl.BlockSpec((None, 2 * H, H), lambda l, s: (l, 0, 0)),  # conv weight of layer l
                pl.BlockSpec((H, CP), lambda l, s: (0, 0)),              # fc1 weight (lane padded)
                pl.BlockSpec((1, CP), lambda l, s: (0, 0)),              # fc1 bias (lane padded)
            ],
            out_specs=pl.BlockSpec((N, CP), lambda l, s: (0, 0)),
            scratch_shapes=[
                pltpu.VMEM((N, H), jnp.float32),   # h   (persists across layers)
                pltpu.VMEM((N, H), jnp.float32),   # h0
            ],
        ),
        compiler_params=pltpu.CompilerParams(
            dimension_semantics=("arbitrary",),    # layers are sequentially dependent
        ),
    )(scal, x_bf, adj_bf, fc0_w, fc0_b, conv_w, fc1_w, fc1_b)

    return out_padded[:, :C], None


# ---------------------------------------------------------------------------
# Deterministic parameter init (mirrors PyTorch init ranges / shapes)
# ---------------------------------------------------------------------------
def init_params(key, num_features, hidden, num_classes, num_layers):
    keys = jax.random.split(key, 4 + num_layers)
    s0 = 1.0 / math.sqrt(num_features)   # nn.Linear(num_features, hidden)
    s1 = 1.0 / math.sqrt(hidden)         # nn.Linear(hidden, num_classes) and conv stdv
    params = {
        # stored already transposed to [in, out]
        "fc0_w": jax.random.uniform(keys[0], (num_features, hidden), jnp.float32, -s0, s0),
        "fc0_b": jax.random.uniform(keys[1], (hidden,), jnp.float32, -s0, s0),
        "fc1_w": jax.random.uniform(keys[2], (hidden, num_classes), jnp.float32, -s1, s1),
        "fc1_b": jax.random.uniform(keys[3], (num_classes,), jnp.float32, -s1, s1),
        "conv_ws": [
            jax.random.uniform(keys[4 + l], (2 * hidden, hidden), jnp.float32, -s1, s1)
            for l in range(num_layers)
        ],
    }
    return params


if __name__ == "__main__":
    N = 16              # number of nodes (sublane-aligned: multiple of 8)
    NUM_FEATURES = 128  # lane-aligned feature dims (multiples of 128)
    HIDDEN = 128
    NUM_CLASSES = 8     # padded to 128 lanes inside the kernel, sliced back outside
    NUM_LAYERS = 4

    key = jax.random.PRNGKey(0)
    kx, kp = jax.random.split(key)

    x = jax.random.normal(kx, (N, NUM_FEATURES), jnp.float32)

    # deterministic ring graph (both directions)
    src = jnp.arange(N, dtype=jnp.int32)
    dst = (src + 1) % N
    edge_index = jnp.stack(
        [jnp.concatenate([src, dst]), jnp.concatenate([dst, src])], axis=0
    )

    params = init_params(kp, NUM_FEATURES, HIDDEN, NUM_CLASSES, NUM_LAYERS)

    out, _ = gcnii_forward(x, edge_index, params)
    jax.block_until_ready(out)
    assert out.shape == (N, NUM_CLASSES)
    assert bool(jnp.all(jnp.isfinite(out)))
    print("KERNEL_OK")
</pallas_src>

<mosaic_0001>
module attributes {stable_mosaic.version = 11 : i64} {
  func.func @_gcnii_fused_kernel(%arg0: i32, %arg1: memref<5xf32, #tpu.memory_space<smem>>, %arg2: memref<16x128xbf16, #tpu.memory_space<vmem>>, %arg3: memref<16x16xbf16, #tpu.memory_space<vmem>>, %arg4: memref<128x128xbf16, #tpu.memory_space<vmem>>, %arg5: memref<1x128xf32, #tpu.memory_space<vmem>>, %arg6: memref<1x256x128xbf16, #tpu.memory_space<vmem>>, %arg7: memref<128x128xbf16, #tpu.memory_space<vmem>>, %arg8: memref<1x128xf32, #tpu.memory_space<vmem>>, %arg9: memref<16x128xf32, #tpu.memory_space<vmem>>, %arg10: memref<16x128xf32, #tpu.memory_space<vmem>>, %arg11: memref<16x128xf32, #tpu.memory_space<vmem>>) attributes {dimension_semantics = [#tpu.dimension_semantics<arbitrary>], iteration_bounds = array<i64: 4>, scalar_prefetch = 1 : i64, scratch_operands = 2 : i64, tpu.core_type = #tpu.core_type<tc>, window_params = [{pipeline_mode = #tpu.pipeline_mode<synchronous>, transform_indices = @transform_0, window_bounds = array<i64: 16, 128>}, {pipeline_mode = #tpu.pipeline_mode<synchronous>, transform_indices = @transform_1, window_bounds = array<i64: 16, 16>}, {pipeline_mode = #tpu.pipeline_mode<synchronous>, transform_indices = @transform_2, window_bounds = array<i64: 128, 128>}, {pipeline_mode = #tpu.pipeline_mode<synchronous>, transform_indices = @transform_3, window_bounds = array<i64: 1, 128>}, {transform_indices = @transform_4, window_bounds = array<i64: 1, 256, 128>}, {pipeline_mode = #tpu.pipeline_mode<synchronous>, transform_indices = @transform_5, window_bounds = array<i64: 128, 128>}, {pipeline_mode = #tpu.pipeline_mode<synchronous>, transform_indices = @transform_6, window_bounds = array<i64: 1, 128>}, {pipeline_mode = #tpu.pipeline_mode<synchronous>, transform_indices = @transform_7, window_bounds = array<i64: 16, 128>}]} {
    %c0_i32 = arith.constant 0 : i32
    %0 = arith.cmpi eq, %arg0, %c0_i32 : i32
    %1 = arith.extui %0 : i1 to i32
    %c0_i32_0 = arith.constant 0 : i32
    %2 = arith.cmpi ne, %1, %c0_i32_0 : i32
    scf.if %2 {
      %c0_17 = arith.constant 0 : index
      %c0_18 = arith.constant 0 : index
      %35 = vector.load %arg2[%c0_17, %c0_18] : memref<16x128xbf16, #tpu.memory_space<vmem>>, vector<16x128xbf16>
      %c0_19 = arith.constant 0 : index
      %c0_20 = arith.constant 0 : index
      %36 = vector.load %arg4[%c0_19, %c0_20] : memref<128x128xbf16, #tpu.memory_space<vmem>>, vector<128x128xbf16>
      %cst_21 = arith.constant dense<0.000000e+00> : vector<16x128xf32>
      %37 = tpu.matmul %35, %36, %cst_21 {dimension_numbers = #tpu.dot_dimension_numbers<[1], [0], [0], [1], [0, 0, 1, 1], [], []>} : vector<16x128xbf16>, vector<128x128xbf16>, vector<16x128xf32> -> vector<16x128xf32>
      %c0_22 = arith.constant 0 : index
      %c0_23 = arith.constant 0 : index
      %38 = vector.load %arg5[%c0_22, %c0_23] : memref<1x128xf32, #tpu.memory_space<vmem>>, vector<1x128xf32>
      %39 = vector.broadcast %38 : vector<1x128xf32> to vector<16x128xf32>
      %40 = arith.addf %37, %39 : vector<16x128xf32>
      %cst_24 = arith.constant 0.000000e+00 : f32
      %41 = vector.broadcast %cst_24 : f32 to vector<16x128xf32>
      %42 = arith.maximumf %40, %41 : vector<16x128xf32>
      %c0_25 = arith.constant 0 : index
      %c0_26 = arith.constant 0 : index
      %43 = vector.load %arg10[%c0_25, %c0_26] : memref<16x128xf32, #tpu.memory_space<vmem>>, vector<16x128xf32>
      tpu.vector_store %arg10[%c0_25, %c0_26], %42 {strides = array<i32>} : memref<16x128xf32, #tpu.memory_space<vmem>>, vector<16x128xf32>,
      %c0_27 = arith.constant 0 : index
      %c0_28 = arith.constant 0 : index
      %44 = vector.load %arg11[%c0_27, %c0_28] : memref<16x128xf32, #tpu.memory_space<vmem>>, vector<16x128xf32>
      tpu.vector_store %arg11[%c0_27, %c0_28], %42 {strides = array<i32>} : memref<16x128xf32, #tpu.memory_space<vmem>>, vector<16x128xf32>,
    } else {
    }
    %c0 = arith.constant 0 : index
    %3 = memref.load %arg1[%c0] : memref<5xf32, #tpu.memory_space<smem>>
    %c1_i32 = arith.constant 1 : i32
    %4 = arith.addi %c1_i32, %arg0 : i32
    %5 = arith.index_cast %4 : i32 to index
    %6 = memref.load %arg1[%5] : memref<5xf32, #tpu.memory_space<smem>>
    %c0_1 = arith.constant 0 : index
    %c0_2 = arith.constant 0 : index
    %7 = vector.load %arg11[%c0_1, %c0_2] : memref<16x128xf32, #tpu.memory_space<vmem>>, vector<16x128xf32>
    %c0_3 = arith.constant 0 : index
    %c0_4 = arith.constant 0 : index
    %8 = vector.load %arg3[%c0_3, %c0_4] : memref<16x16xbf16, #tpu.memory_space<vmem>>, vector<16x16xbf16>
    %c0_5 = arith.constant 0 : index
    %c0_6 = arith.constant 0 : index
    %9 = vector.load %arg10[%c0_5, %c0_6] : memref<16x128xf32, #tpu.memory_space<vmem>>, vector<16x128xf32>
    %10 = arith.truncf %9 : vector<16x128xf32> to vector<16x128xbf16>
    %cst = arith.constant dense<0.000000e+00> : vector<16x128xf32>
    %11 = tpu.matmul %8, %10, %cst {dimension_numbers = #tpu.dot_dimension_numbers<[1], [0], [0], [1], [0, 0, 1, 1], [], []>} : vector<16x16xbf16>, vector<16x128xbf16>, vector<16x128xf32> -> vector<16x128xf32>
    %12 = tpu.concatenate %11, %7 in 1 : vector<16x128xf32>, vector<16x128xf32> -> vector<16x256xf32>
    %13 = arith.truncf %12 : vector<16x256xf32> to vector<16x256xbf16>
    %c0_7 = arith.constant 0 : index
    %c0_8 = arith.constant 0 : index
    %c0_9 = arith.constant 0 : index
    %14 = vector.load %arg6[%c0_7, %c0_8, %c0_9] : memref<1x256x128xbf16, #tpu.memory_space<vmem>>, vector<1x256x128xbf16>
    %15 = vector.shape_cast %14 : vector<1x256x128xbf16> to vector<256x128xbf16>
    %cst_10 = arith.constant dense<0.000000e+00> : vector<16x128xf32>
    %16 = tpu.matmul %13, %15, %cst_10 {dimension_numbers = #tpu.dot_dimension_numbers<[1], [0], [0], [1], [0, 0, 1, 1], [], []>} : vector<16x256xbf16>, vector<256x128xbf16>, vector<16x128xf32> -> vector<16x128xf32>
    %cst_11 = arith.constant 1.000000e+00 : f32
    %17 = arith.subf %cst_11, %3 : f32
    %18 = vector.broadcast %17 : f32 to vector<16x128xf32>
    %19 = arith.mulf %18, %11 : vector<16x128xf32>
    %20 = vector.broadcast %3 : f32 to vector<16x128xf32>
    %21 = arith.mulf %20, %7 : vector<16x128xf32>
    %22 = arith.addf %19, %21 : vector<16x128xf32>
    %23 = vector.broadcast %6 : f32 to vector<16x128xf32>
    %24 = arith.mulf %23, %16 : vector<16x128xf32>
    %cst_12 = arith.constant 1.000000e+00 : f32
    %25 = arith.subf %cst_12, %6 : f32
    %26 = vector.broadcast %25 : f32 to vector<16x128xf32>
    %27 = arith.mulf %26, %22 : vector<16x128xf32>
    %28 = arith.addf %24, %27 : vector<16x128xf32>
    %cst_13 = arith.constant 0.000000e+00 : f32
    %29 = vector.broadcast %cst_13 : f32 to vector<16x128xf32>
    %30 = arith.maximumf %28, %29 : vector<16x128xf32>
    %c0_14 = arith.constant 0 : index
    %c0_15 = arith.constant 0 : index
    %31 = vector.load %arg10[%c0_14, %c0_15] : memref<16x128xf32, #tpu.memory_space<vmem>>, vector<16x128xf32>
    tpu.vector_store %arg10[%c0_14, %c0_15], %30 {strides = array<i32>} : memref<16x128xf32, #tpu.memory_space<vmem>>, vector<16x128xf32>,
    %c3_i32 = arith.constant 3 : i32
    %32 = arith.cmpi eq, %arg0, %c3_i32 : i32
    %33 = arith.extui %32 : i1 to i32
    %c0_i32_16 = arith.constant 0 : i32
    %34 = arith.cmpi ne, %33, %c0_i32_16 : i32
    scf.if %34 {
      %c0_17 = arith.constant 0 : index
      %c0_18 = arith.constant 0 : index
      %35 = vector.load %arg10[%c0_17, %c0_18] : memref<16x128xf32, #tpu.memory_space<vmem>>, vector<16x128xf32>
      %36 = arith.truncf %35 : vector<16x128xf32> to vector<16x128xbf16>
      %c0_19 = arith.constant 0 : index
      %c0_20 = arith.constant 0 : index
      %37 = vector.load %arg7[%c0_19, %c0_20] : memref<128x128xbf16, #tpu.memory_space<vmem>>, vector<128x128xbf16>
      %cst_21 = arith.constant dense<0.000000e+00> : vector<16x128xf32>
      %38 = tpu.matmul %36, %37, %cst_21 {dimension_numbers = #tpu.dot_dimension_numbers<[1], [0], [0], [1], [0, 0, 1, 1], [], []>} : vector<16x128xbf16>, vector<128x128xbf16>, vector<16x128xf32> -> vector<16x128xf32>
      %c0_22 = arith.constant 0 : index
      %c0_23 = arith.constant 0 : index
      %39 = vector.load %arg8[%c0_22, %c0_23] : memref<1x128xf32, #tpu.memory_space<vmem>>, vector<1x128xf32>
      %40 = vector.broadcast %39 : vector<1x128xf32> to vector<16x128xf32>
      %41 = arith.addf %38, %40 : vector<16x128xf32>
      %42 = tpu.iota {dimensions = array<i32: 1>} : vector<16x128xi32>
      %c8_i32 = arith.constant 8 : i32
      %43 = vector.broadcast %c8_i32 : i32 to vector<16x128xi32>
      %44 = arith.cmpi slt, %42, %43 : vector<16x128xi32>
      %cst_24 = arith.constant 0xFF800000 : f32
      %45 = vector.broadcast %cst_24 : f32 to vector<16x128xf32>
      %46 = arith.select %44, %41, %45 : vector<16x128xi1>, vector<16x128xf32>
      %cst_25 = arith.constant dense<0xFF800000> : vector<16xf32>
      %47 = vector.multi_reduction <maximumf>, %46, %cst_25 [1] : vector<16x128xf32> to vector<16xf32>
      %48 = vector.shape_cast %47 : vector<16xf32> to vector<16x1xf32>
      %49 = vector.broadcast %48 : vector<16x1xf32> to vector<16x128xf32>
      %50 = arith.subf %46, %49 : vector<16x128xf32>
      %51 = math.exp %50 : vector<16x128xf32>
      %cst_26 = arith.constant dense<0.000000e+00> : vector<16xf32>
      %52 = vector.multi_reduction <add>, %51, %cst_26 [1] : vector<16x128xf32> to vector<16xf32>
      %53 = vector.shape_cast %52 : vector<16xf32> to vector<16x1xf32>
      %54 = math.log %53 : vector<16x1xf32>
      %55 = arith.addf %54, %48 : vector<16x1xf32>
      %c8_i32_27 = arith.constant 8 : i32
      %56 = vector.broadcast %c8_i32_27 : i32 to vector<16x128xi32>
      %57 = arith.cmpi slt, %42, %56 : vector<16x128xi32>
      %58 = vector.broadcast %55 : vector<16x1xf32> to vector<16x128xf32>
      %59 = arith.subf %46, %58 : vector<16x128xf32>
      %cst_28 = arith.constant 0.000000e+00 : f32
      %60 = vector.broadcast %cst_28 : f32 to vector<16x128xf32>
      %61 = arith.select %57, %59, %60 : vector<16x128xi1>, vector<16x128xf32>
      %c0_29 = arith.constant 0 : index
      %c0_30 = arith.constant 0 : index
      %62 = vector.load %arg9[%c0_29, %c0_30] : memref<16x128xf32, #tpu.memory_space<vmem>>, vector<16x128xf32>
      tpu.vector_store %arg9[%c0_29, %c0_30], %61 {strides = array<i32>} : memref<16x128xf32, #tpu.memory_space<vmem>>, vector<16x128xf32>,
    } else {
    }
    return
  }
  func.func @transform_0(%arg0: i32, %arg1: memref<5xf32, #tpu.memory_space<smem>>) -> (i32, i32) {
    %c0_i32 = arith.constant 0 : i32
    %c0_i32_0 = arith.constant 0 : i32
    %c0_i32_1 = arith.constant 0 : i32
    return %c0_i32, %c0_i32_0 : i32, i32
  }
  func.func @transform_1(%arg0: i32, %arg1: memref<5xf32, #tpu.memory_space<smem>>) -> (i32, i32) {
    %c0_i32 = arith.constant 0 : i32
    %c0_i32_0 = arith.constant 0 : i32
    %c0_i32_1 = arith.constant 0 : i32
    return %c0_i32, %c0_i32_0 : i32, i32
  }
  func.func @transform_2(%arg0: i32, %arg1: memref<5xf32, #tpu.memory_space<smem>>) -> (i32, i32) {
    %c0_i32 = arith.constant 0 : i32
    %c0_i32_0 = arith.constant 0 : i32
    %c0_i32_1 = arith.constant 0 : i32
    return %c0_i32, %c0_i32_0 : i32, i32
  }
  func.func @transform_3(%arg0: i32, %arg1: memref<5xf32, #tpu.memory_space<smem>>) -> (i32, i32) {
    %c0_i32 = arith.constant 0 : i32
    %c0_i32_0 = arith.constant 0 : i32
    %c0_i32_1 = arith.constant 0 : i32
    return %c0_i32, %c0_i32_0 : i32, i32
  }
  func.func @transform_4(%arg0: i32, %arg1: memref<5xf32, #tpu.memory_space<smem>>) -> (i32, i32, i32) {
    %c0_i32 = arith.constant 0 : i32
    %c0_i32_0 = arith.constant 0 : i32
    %c0_i32_1 = arith.constant 0 : i32
    return %arg0, %c0_i32, %c0_i32_0 : i32, i32, i32
  }
  func.func @transform_5(%arg0: i32, %arg1: memref<5xf32, #tpu.memory_space<smem>>) -> (i32, i32) {
    %c0_i32 = arith.constant 0 : i32
    %c0_i32_0 = arith.constant 0 : i32
    %c0_i32_1 = arith.constant 0 : i32
    return %c0_i32, %c0_i32_0 : i32, i32
  }
  func.func @transform_6(%arg0: i32, %arg1: memref<5xf32, #tpu.memory_space<smem>>) -> (i32, i32) {
    %c0_i32 = arith.constant 0 : i32
    %c0_i32_0 = arith.constant 0 : i32
    %c0_i32_1 = arith.constant 0 : i32
    return %c0_i32, %c0_i32_0 : i32, i32
  }
  func.func @transform_7(%arg0: i32, %arg1: memref<5xf32, #tpu.memory_space<smem>>) -> (i32, i32) {
    %c0_i32 = arith.constant 0 : i32
    %c0_i32_0 = arith.constant 0 : i32
    %c0_i32_1 = arith.constant 0 : i32
    return %c0_i32, %c0_i32_0 : i32, i32
  }
}

</mosaic_0001>

<bundles_post_ra>
// kernel: tpu_custom_call.1
= control target key start
LH: loop header
LB: loop body
LE: loop exit
PB: predicated region body
PF: predicated region fallthrough
CT: control target
= control target key end

     0   :  { %s1437_s30 = smov [#allocation5]   ;;  %s1678_s0 = inlined_call_operand.hbm [shape: f32[5], index: 0, kind: input, shape index: {}]   ;;  %s1679_s1 = inlined_call_operand.hbm [shape: bf16[16,128], index: 1, kind: input, shape index: {}]   ;;  %s1680_s2 = inlined_call_operand.hbm [shape: bf16[16,16], index: 2, kind: input, shape index: {}]   ;;  %s1681_s3 = inlined_call_operand.hbm [shape: bf16[128,128], index: 3, kind: input, shape index: {}]   ;;  %s1682_s4 = inlined_call_operand.vmem [shape: f32[1,128], index: 4, kind: input, shape index: {}]   ;;  %s1683_s5 = inlined_call_operand.hbm [shape: bf16[4,256,128], index: 5, kind: input, shape index: {}]   ;;  %s1684_s6 = inlined_call_operand.hbm [shape: bf16[128,128], index: 6, kind: input, shape index: {}]   ;;  %s1685_s7 = inlined_call_operand.vmem [shape: f32[1,128], index: 7, kind: input, shape index: {}]   ;;  %s1686_s8 = inlined_call_operand.hbm [shape: f32[16,128], index: 8, kind: output, shape index: {}]  }
   0x1   :  { %s14_s29 = sshll.u32 %s1678_s0, 4  ;;  %s15_s29 = int_to_ptr.hbm [resolvable:$true] %s14_s29 }
   0x2   :  { %17 = dma.hbm_to_smem %s15_s29, 16, %s1437_s30, [#allocation4] }
   0x3   :  { %1399 = dma.done.wait [#allocation4], 16 }
   0x4   :  { %1400 = vsyncadd [#allocation4], 4294967280 }
   0x5   :  { %20 = sfence }
   0x6   :  { %21 = vsyncpa [#allocation7], 0 }
   0x7   :  { %22 = vsyncpa [#allocation10], 0 }
   0x8   :  { %23 = vsyncpa [#allocation13], 0 }
   0x9   :  { %25 = vsyncpa [#allocation13 + $0x1], 0 }
   0xa   :  { %26 = vsyncpa [#allocation8], 0  ;;  %s1495_s9 = smov 0   ;;  %s1497_s10 = smov 0  }
   0xb   :  { %s1499_s11 = smov 0   ;;  %s1501_s12 = smov 0  }
   0xc LB: > { %s1514_s0 = sadd.s32 4294967295, %s1435_s12   ;;  %p136_p0 = scmp.ne.s32.totalorder %s1427_s10, %s1423_s9  ;;  %s1435_s12 = sphi %s1501_s12, %s1696_s12   ;;  %s1431_s11 = sphi %s1499_s11, %s1695_s11   ;;  %s1427_s10 = sphi %s1497_s10, %s1694_s10   ;;  %s1423_s9 = sphi %s1495_s9, %s1693_s9  }
   0xd   : > { %p137_p1 = scmp.eq.s32.totalorder %s1514_s0, 0  ;;  %p898_p2 = scmp.ge.s32.totalorder %s1435_s12, 1 }
   0xe   : > { %p210_p3 = scmp.lt.s32.totalorder %s1435_s12, 5  ;;  %p899_p4 = scmp.ne.s32.totalorder %s1514_s0, 0 }
   0xf   : > { %p1523_p5 = por %p137_p1, %p136_p0  ;;  %s235_s17 = sshll.u32 %s1680_s2, 4  ;;  %s236_s17 = int_to_ptr.hbm [resolvable:$true] %s235_s17 }
  0x10   : > { %p1527_p6 = pnand %p898_p2, %p210_p3  ;;  %s1438_s18 = smov [#allocation9]  }
  0x11   : > { %s237_s19 = sshll.u32 %s1438_s18, 4  ;;  %s266_s23 = sshll.u32 %s1684_s6, 4  ;;  %s238_s19 = int_to_ptr.vmem [resolvable:$true] %s237_s19  ;;  %s267_s23 = int_to_ptr.hbm [resolvable:$true] %s266_s23 }
  0x12   : > { %p1113_p7 = pneg %p1527_p6  ;;  %s1687_s24 = smov 64  }
  0x13   : > { %s1440_s25 = smov 4   ;;  %s1441_s26 = smov [#allocation14]  }
  0x14   : > { %p1538_p8 = pnand %p1113_p7, %p137_p1  ;;  %s268_s27 = sshll.u32 %s1441_s26, 4  ;;  %s269_s27 = int_to_ptr.vmem [resolvable:$true] %s268_s27 }
  0x15   : > { %s221_s30 = sshll.u32 %s1679_s1, 4  ;;  %s249_s16 = sshll.u32 %s1681_s3, 4  ;;  %s222_s30 = int_to_ptr.hbm [resolvable:$true] %s221_s30  ;;  %s250_s16 = int_to_ptr.hbm [resolvable:$true] %s249_s16 }
  0x16   : > { %1119 = dma.hbm_to_vmem [thread:$0]  (!%p1538_p8), %s236_s17, 128, %s238_s19, [#allocation10], %s1687_s24, %s1687_s24, %s1440_s25  }
  0x17   : > { %1125 = dma.hbm_to_vmem [thread:$0]  (!%p1538_p8), %s267_s23, 1024, %s269_s27, [#allocation13], %s1687_s24, %s1687_s24, %s1440_s25  }
  0x18   : > { %s1442_s17 = smov [#allocation6]   ;;  %s1443_s19 = smov [#allocation11]  }
  0x19   : > { %s223_s18 = sshll.u32 %s1442_s17, 4  ;;  %s251_s21 = sshll.u32 %s1443_s19, 4  ;;  %s224_s18 = int_to_ptr.vmem [resolvable:$true] %s223_s18  ;;  %s252_s21 = int_to_ptr.vmem [resolvable:$true] %s251_s21 }
  0x1a   : > { %1116 = dma.hbm_to_vmem [thread:$0]  (!%p1538_p8), %s222_s30, 128, %s224_s18, [#allocation7], %s1687_s24, %s1687_s24, %s1440_s25  }
  0x1b   : > { %1122 = dma.hbm_to_vmem [thread:$0]  (!%p1538_p8), %s250_s16, 1024, %s252_s21, [#allocation10], %s1687_s24, %s1687_s24, %s1440_s25  }
  0x1c   : > { %s1572_s22 = sadd.s32 1, %s1435_s12   ;;  %s123_s23 = sadd.s32 1, %s1431_s11 }
  0x1d   : > { %s120_s26 = ssub.s32 %s1435_s12, %s1572_s22  ;;  %p130_p9 = scmp.ne.s32.totalorder %s1431_s11, %s1427_s10 }
  0x1e   : > { %p121_p10 = scmp.eq.s32.totalorder %s120_s26, 0  ;;  %p131_p11 = scmp.eq.s32.totalorder %s1435_s12, 0 }
  0x1f   : > { %p1134_p12 = scmp.lt.s32.totalorder %s1435_s12, 4  ;;  %s285_s27 = sand.u32 1, %s1435_s12  }
  0x20   : > { %s1583_s28 = scalar_select %p121_p10, %s1431_s11, %s123_s23  }
  0x21   : > { %p132_p13 = por %p131_p11, %p130_p9  ;;  %s287_s29 = sand.u32 1, %s1431_s11  }
  0x22   : > { %s1056_s20 = sshll.u32 %s1435_s12, 7  ;;  %s904_s30 = sshll.u32 %s287_s29, 7 }
  0x23   : > { %s294_s16 = scalar_lea.hbm %s1683_s5, %s1056_s20  ;;  %s289_s18 = scalar_lea.vmem [#allocation12], %s904_s30 }
  0x24   : > { %s295_s17 = sshll.u32 %s294_s16, 4  ;;  %s297_s19 = sshll.u32 %s289_s18, 4  ;;  %s296_s17 = int_to_ptr.hbm [resolvable:$true] %s295_s17  ;;  %s298_s19 = int_to_ptr.vmem [resolvable:$true] %s297_s19 }
  0x25   : > { %p1592_p0 = pnand %p1134_p12, %p132_p13  ;;  %s286_s23 = scalar_lea.sflag [#allocation13], %s285_s27 }
  0x26   : > { %s1325_s26 = sshra.s32 %s296_s17, 4  ;;  %s1332_s30 = scalar_lea.hbm %s1683_s5, 512  ;;  %s1326_s26 = int_to_ptr.hbm [resolvable:$true] %s1325_s26 }
  0x27   : > { %s1327_s24 = scalar_lea.hbm %s1326_s26, 128  ;;  %p1329_p3 = pneg %p1592_p0 }
  0x28   : > { %p1328_p2 = scmp.ne.s32.totalorder %s1326_s26, %s1327_s24  ;;  %p1333_p9 = scmp.lt.s32.totalorder %s1326_s26, %s1683_s5 }
  0x29   : > { %p1334_p10 = scmp.lt.s32.totalorder %s1332_s30, %s1327_s24 }
  0x2a   : > { %p1330_p7 = pnand %p1329_p3, %p1328_p2 }
  0x2b   : > { %p1335_p11 = por %p1334_p10, %p1333_p9 }
  0x2c   : > { %p1331_p8 = pneg %p1330_p7 }
  0x2e   : > { %p1336_p12 = pnand %p1335_p11, %p1331_p8 }
  0x30   : > { %1339 = shalt.err (!%p1336_p12)
}
  0x31   : > { %s1692_s27 = smov 64   ;;  %309 = sbr.rel (%p1527_p6) target bundleno = 963 (0x3c3), region = 48 }
  0x32   : > { %1129 = dma.hbm_to_vmem [thread:$0]  (!%p1592_p0), %s296_s17, 2048, %s298_s19, %s286_s23, %s1692_s27, %s1692_s27, %s1440_s25  }
  0x36   : > { %1402 = dma.done.wait (%p137_p1), [#allocation7], 128  }
  0x37   : > { %1404 = vsyncadd (%p137_p1), [#allocation7], 4294967168 }
  0x38   : > { %1406 = dma.done.wait (%p137_p1), [#allocation10], 1152  }
  0x39   : > { %1408 = vsyncadd (%p137_p1), [#allocation10], 4294966144  ;;  %s326_s24 = sand.u32 1, %s1514_s0   ;;  %s328_s25 = sand.u32 1, %s1427_s10  }
  0x3a   : > { %s911_s15 = sshll.u32 %s328_s25, 7  ;;  %s327_s14 = scalar_lea.sflag [#allocation13], %s326_s24 }
  0x3b   : > { %s1621_s16 = scalar_lea.vmem [#allocation12], %s911_s15 }
  0x3c   : > { %1410 = dma.done.wait (%p1523_p5), %s327_s14, 2048  }
  0x3d   : > { %1412 = vsyncadd (%p1523_p5), %s327_s14, 4294965248 }
  0x3e   : > { %1414 = dma.done.wait (%p137_p1), [#allocation13], 1024  }
  0x3f   : > { %1416 = vsyncadd (%p137_p1), [#allocation13], 4294966272  ;;  %366 = sbr.rel (%p899_p4) target bundleno = 240 (0xf0), region = 72 }
  0x44   : > { %v1065_v0 = vld [vmem:[#allocation11 + $0x38] sm:$0xff]  ;;  %v1064_v1 = vld [vmem:[#allocation11 + $0x30] sm:$0xff]  ;;  %v1063_v2 = vld [vmem:[#allocation11 + $0x28] sm:$0xff] }
  0x45   : > { %443 = vmatpush.bf16.msra.mxu0 %v1065_v0  ;;  %v1062_v3 = vld [vmem:[#allocation11 + $0x20] sm:$0xff]  ;;  %v1061_v4 = vld [vmem:[#allocation11 + $0x18] sm:$0xff]  ;;  %v1060_v5 = vld [vmem:[#allocation11 + $0x10] sm:$0xff] }
  0x46   : > { %v1059_v6 = vld [vmem:[#allocation11 + $0x8] sm:$0xff]  ;;  %v1058_v7 = vld [vmem:[#allocation11] sm:$0xff]  ;;  %v1057_v8 = vld [vmem:[#allocation6] sm:$0xff] }
  0x47   : > { %v1183_v9 = vld [vmem:[%s1682_s4] ss:$0 sm:$0xff] }
  0x49   : > { %444 = vmatpush.bf16.msra.mxu0 %v1064_v1 }
  0x4d   : > { %445 = vmatpush.bf16.msra.mxu0 %v1063_v2 }
  0x51   : > { %446 = vmatpush.bf16.msra.mxu0 %v1062_v3 }
  0x55   : > { %447 = vmatpush.bf16.msra.mxu0 %v1061_v4 }
  0x59   : > { %448 = vmatpush.bf16.msra.mxu0 %v1060_v5 }
  0x5d   : > { %449 = vmatpush.bf16.msra.mxu0 %v1059_v6 }
  0x61   : > { %450 = vmatpush.bf16.msra.mxu0 %v1058_v7 }
  0x64   : > { %451 = vmatmul.bf16.vlgmr.msra.gmra.mxu0 %v1057_v8 }
  0xe1   : > { %v452_v10 = vpop.f32.mrf.mxu0 }
  0xe2   : > { %v453_v11 = vadd.f32 %v1183_v9, %v452_v10 }
  0xe4   : > { %v457_v12 = vmax.f32 %v453_v11, 0.0 }
  0xe6   : > { %459 = vst [vmem:[#allocation2] sm:$0xff] %v457_v12 }
  0xe7   : > { %461 = vst [vmem:[#allocation3 + $0x8] sm:$0xff] %v457_v12 }
  0xe9   : > { %v454_v13 = vpop.f32.mrf.mxu0 }
  0xea   : > { %v455_v14 = vadd.f32 %v1183_v9, %v454_v13 }
  0xec   : > { %v458_v15 = vmax.f32 %v455_v14, 0.0 }
  0xee   : > { %460 = vst [vmem:[#allocation2 + $0x8] sm:$0xff] %v458_v15 }
  0xef   : > { %462 = vst [vmem:[#allocation3] sm:$0xff] %v458_v15 }
  0xf0 PF: > { %v470_v16 = vld [vmem:[#allocation2] sm:$0xff]  ;;  %v1082_v19 = vld [vmem:[%s1621_s16 + $0x78] sm:$0xff]  ;;  %vm478_vm0 = vcmask 130048   ;;  %v1080_v24 = vld [vmem:[%s1621_s16 + $0x68] sm:$0xff]  ;;  %s463_s18 = sld [smem:[#allocation5]]  ;;  %s464_s21 = sadd.s32 1, %s1514_s0 }
  0xf1   : > { %v1066_v20 = vld [vmem:[#allocation9] sm:$0xff]  ;;  %640 = vmatpush.bf16.msra.mxu2 %v1082_v19  ;;  %v1081_v22 = vld [vmem:[%s1621_s16 + $0x70] sm:$0xff]  ;;  %v1072_v25 = vld [vmem:[%s1621_s16 + $0x28] sm:$0xff]  ;;  %s465_s23 = sld [smem:[#allocation5 + %s464_s21]]  ;;  %p1019_p1 = scmp.ne.s32.totalorder %s1514_s0, 3 }
  0xf2   : > { %v1074_v21 = vld [vmem:[%s1621_s16 + $0x38] sm:$0xff]  ;;  %v1073_v23 = vld [vmem:[%s1621_s16 + $0x30] sm:$0xff]  ;;  %v1079_v26 = vld [vmem:[%s1621_s16 + $0x60] sm:$0xff] }
  0xf3   : > { %626 = vmatpush.bf16.msra.mxu1 %v1074_v21  ;;  %v1071_v27 = vld [vmem:[%s1621_s16 + $0x20] sm:$0xff]  ;;  %v1078_v28 = vld [vmem:[%s1621_s16 + $0x58] sm:$0xff]  ;;  %v1077_v30 = vld [vmem:[%s1621_s16 + $0x50] sm:$0xff] }
  0xf4   : > { %v1070_v29 = vld [vmem:[%s1621_s16 + $0x18] sm:$0xff]  ;;  %v1076_v31 = vld [vmem:[%s1621_s16 + $0x48] sm:$0xff]  ;;  %v1075_v32 = vld [vmem:[%s1621_s16 + $0x40] sm:$0xff] }
  0xf5   : > { %v471_v17 = vld [vmem:[#allocation2 + $0x8] sm:$0xff]  ;;  %641 = vmatpush.bf16.msra.mxu2 %v1081_v22  ;;  %v466_v33 = vld [vmem:[#allocation3 + $0x8] sm:$0xff]  ;;  %v1069_v36 = vld [vmem:[%s1621_s16 + $0x10] sm:$0xff] }
  0xf6   : > { %v472_v18 = vpack.c.bf16 %v471_v17, %v470_v16  ;;  %v467_v34 = vld [vmem:[#allocation3] sm:$0xff]  ;;  %v1068_v37 = vld [vmem:[%s1621_s16 + $0x8] sm:$0xff]  ;;  %s654_s19 = ssub.f32 1.0, %s463_s18  ;;  %v658_v39 = vstv %s463_s18 }
  0xf7   : > { %627 = vmatpush.bf16.msra.mxu1 %v1073_v23  ;;  %v497_v35 = vpack.c.bf16 %v467_v34, %v466_v33  ;;  %v1067_v38 = vld [vmem:[%s1621_s16] sm:$0xff]  ;;  %v659_v41 = vmul.f32 %v658_v39, %v466_v33  ;;  %v660_v45 = vmul.f32 %v658_v39, %v467_v34  ;;  %s666_s26 = ssub.f32 1.0, %s465_s23  ;;  %v663_v53 = vstv %s465_s23 }
  0xf8   : > { %489 = vmatpush.bf16.msra.mxu0 %v472_v18  ;;  %v655_v40 = vstv %s654_s19 }
  0xf9   : > { %642 = vmatpush.bf16.msra.mxu2 %v1080_v24  ;;  %v667_v51 = vstv %s666_s26 }
  0xfb   : > { %954 = vmatmul.msk.bf16.vlgmr.msra.gmra.mxu0 %vm478_vm0, %v1066_v20  ;;  %628 = vmatpush.bf16.msra.mxu1 %v1072_v25 }
  0xfd   : > { %643 = vmatpush.bf16.msra.mxu2 %v1079_v26 }
  0xff   : > { %629 = vmatpush.bf16.msra.mxu1 %v1071_v27 }
 0x101   : > { %644 = vmatpush.bf16.msra.mxu2 %v1078_v28 }
 0x103   : > { %630 = vmatpush.bf16.msra.mxu1 %v1070_v29 }
 0x105   : > { %645 = vmatpush.bf16.msra.mxu2 %v1077_v30 }
 0x107   : > { %631 = vmatpush.bf16.msra.mxu1 %v1069_v36 }
 0x109   : > { %646 = vmatpush.bf16.msra.mxu2 %v1076_v31 }
 0x10b   : > { %632 = vmatpush.bf16.msra.mxu1 %v1068_v37 }
 0x10d   : > { %647 = vmatpush.bf16.msra.mxu2 %v1075_v32 }
 0x10f   : > { %633 = vmatpush.bf16.msra.mxu1 %v1067_v38 }
 0x110   : > { %648 = vmatmul.bf16.vlgmr.msra.gmra.mxu2 %v497_v35 }
 0x178   : > { %v491_v42 = vpop.f32.mrf.mxu0 }
 0x179   : > { %v656_v43 = vmul.f32 %v655_v40, %v491_v42 }
 0x17b   : > { %v661_v44 = vadd.f32 %v659_v41, %v656_v43 }
 0x17d   : > { %v668_v56 = vmul.f32 %v667_v51, %v661_v44 }
 0x180   : > { %v493_v46 = vpop.f32.mrf.mxu0 }
 0x181   : > { %v496_v47 = vpack.c.bf16 %v493_v46, %v491_v42  ;;  %v657_v48 = vmul.f32 %v655_v40, %v493_v46 }
 0x183   : > { %v662_v49 = vadd.f32 %v660_v45, %v657_v48  ;;  %634 = vmatmul.bf16.vlgmr.msra.gmra.mxu1 %v496_v47 }
 0x185   : > { %v669_v62 = vmul.f32 %v667_v51, %v662_v49 }
 0x193   : > { %v649_v50 = vpop.f32.mrf.mxu2 }
 0x19b   : > { %v651_v59 = vpop.f32.mrf.mxu2 }
 0x200   : > { %v635_v52 = vpop.f32.mrf.mxu1 }
 0x201   : > { %v650_v54 = vadd.f32 %v649_v50, %v635_v52 }
 0x203   : > { %v664_v55 = vmul.f32 %v663_v53, %v650_v54 }
 0x205   : > { %v670_v57 = vadd.f32 %v668_v56, %v664_v55 }
 0x207   : > { %v672_v58 = vmax.f32 %v670_v57, 0.0 }
 0x208   : > { %v637_v60 = vpop.f32.mrf.mxu1 }
 0x209   : > { %674 = vst [vmem:[#allocation2] sm:$0xff] %v672_v58  ;;  %v652_v61 = vadd.f32 %v651_v59, %v637_v60 }
 0x20b   : > { %v665_v63 = vmul.f32 %v663_v53, %v652_v61 }
 0x20d   : > { %v671_v0 = vadd.f32 %v669_v62, %v665_v63  ;;  %679 = sbr.rel (%p1019_p1) target bundleno = 957 (0x3bd), region = 76 }
 0x20f   : > { %v673_v1 = vmax.f32 %v671_v0, 0.0 }
 0x211   : > { %675 = vst [vmem:[#allocation2 + $0x8] sm:$0xff] %v673_v1 }
 0x212   : > { %v1090_v2 = vld [vmem:[#allocation14 + $0x38] sm:$0xff]  ;;  %v1089_v3 = vld [vmem:[#allocation14 + $0x30] sm:$0xff]  ;;  %v1088_v4 = vld [vmem:[#allocation14 + $0x28] sm:$0xff]  ;;  %v765_v13 = vlaneseq }
 0x213   : > { %751 = vmatpush.bf16.msra.mxu0 %v1090_v2  ;;  %v1087_v5 = vld [vmem:[#allocation14 + $0x20] sm:$0xff]  ;;  %v1086_v6 = vld [vmem:[#allocation14 + $0x18] sm:$0xff]  ;;  %v1085_v7 = vld [vmem:[#allocation14 + $0x10] sm:$0xff] }
 0x214   : > { %v1084_v8 = vld [vmem:[#allocation14 + $0x8] sm:$0xff]  ;;  %v1083_v9 = vld [vmem:[#allocation14] sm:$0xff]  ;;  %v680_v10 = vld [vmem:[#allocation2] sm:$0xff]  ;;  %v766_v14 = vand.u32 127, %v765_v13 }
 0x215   : > { %v1184_v15 = vld [vmem:[%s1685_s7] ss:$0 sm:$0xff] }
 0x216   : > { %vm767_vm1 = vcmp.lt.s32.totalorder %v766_v14, 8 }
 0x217   : > { %752 = vmatpush.bf16.msra.mxu0 %v1089_v3 }
 0x218   : > { %v681_v11 = vld [vmem:[#allocation2 + $0x8] sm:$0xff] }
 0x219   : > { %v682_v12 = vpack.c.bf16 %v681_v11, %v680_v10 }
 0x21b   : > { %753 = vmatpush.bf16.msra.mxu0 %v1088_v4 }
 0x21f   : > { %754 = vmatpush.bf16.msra.mxu0 %v1087_v5 }
 0x223   : > { %755 = vmatpush.bf16.msra.mxu0 %v1086_v6 }
 0x227   : > { %756 = vmatpush.bf16.msra.mxu0 %v1085_v7 }
 0x22b   : > { %757 = vmatpush.bf16.msra.mxu0 %v1084_v8 }
 0x22f   : > { %758 = vmatpush.bf16.msra.mxu0 %v1083_v9 }
 0x232   : > { %759 = vmatmul.bf16.vlgmr.msra.gmra.mxu0 %v682_v12 }
 0x2af   : > { %v760_v16 = vpop.f32.mrf.mxu0 }
 0x2b0   : > { %v761_v17 = vadd.f32 %v1184_v15, %v760_v16 }
 0x2b2   : > { %v768_v18 = vsel %vm767_vm1, %v761_v17, -inf }
 0x2b3   : > { %770 = vmax.xlane.f32.xlu0 %v768_v18 }
 0x2b7   : > { %v762_v19 = vpop.f32.mrf.mxu0 }
 0x2b8   : > { %v763_v20 = vadd.f32 %v1184_v15, %v762_v19 }
 0x2ba   : > { %v769_v21 = vsel %vm767_vm1, %v763_v20, -inf }
 0x2bb   : > { %772 = vmax.xlane.f32.xlu0 %v769_v21 }
 0x326   : > { %v771_v22 = vpop.xlane.xlu0 %770 }
 0x327   : > { %v774_v23 = vsub.f32 %v768_v18, %v771_v22 }
 0x329   : > { %v776_v24 = vmul.f32 1.442695, %v774_v23 }
 0x32b   : > { %1185 = vpow2.f32 %v776_v24 }
 0x32e   : > { %v773_v25 = vpop.xlane.xlu0 %772 }
 0x32f   : > { %v775_v26 = vsub.f32 %v769_v21, %v773_v25 }
 0x331   : > { %v1186_v27 = vpop.eup %1185  ;;  %v778_v28 = vmul.f32 1.442695, %v775_v26 }
 0x332   : > { %780 = vadd.xlane.f32.xlu1 %v1186_v27 }
 0x333   : > { %1187 = vpow2.f32 %v778_v28 }
 0x339   : > { %v1188_v29 = vpop.eup %1187 }
 0x33a   : > { %782 = vadd.xlane.f32.xlu1 %v1188_v29 }
 0x3a5   : > { %v781_v30 = vpop.xlane.xlu1 %780 }
 0x3a6   : > { %1189 = vlog2.f32 %v781_v30 }
 0x3ac   : > { %v1190_v31 = vpop.eup %1189 }
 0x3ad   : > { %v785_v32 = vmul.f32 0.6931472, %v1190_v31  ;;  %v783_v33 = vpop.xlane.xlu1 %782 }
 0x3ae   : > { %1191 = vlog2.f32 %v783_v33 }
 0x3af   : > { %v788_v34 = vadd.f32 %v785_v32, %v771_v22 }
 0x3b1   : > { %v790_v35 = vsub.f32 %v768_v18, %v788_v34 }
 0x3b3   : > { %v792_v36 = vsel %vm767_vm1, %v790_v35, 0.0 }
 0x3b4   : > { %v1192_v37 = vpop.eup %1191  ;;  %794 = vst [vmem:[#allocation15] sm:$0xff] %v792_v36 }
 0x3b5   : > { %v787_v38 = vmul.f32 0.6931472, %v1192_v37 }
 0x3b7   : > { %v789_v39 = vadd.f32 %v787_v38, %v773_v25 }
 0x3b9   : > { %v791_v40 = vsub.f32 %v769_v21, %v789_v39 }
 0x3bb   : > { %v793_v41 = vsel %vm767_vm1, %v791_v40, 0.0 }
 0x3bc   : > { %795 = vst [vmem:[#allocation15 + $0x8] sm:$0xff] %v793_v41 }
 0x3bd PF: > { %p1139_p4 = scmp.eq.s32.totalorder %s1514_s0, 3  ;;  %s1444_s30 = smov [#allocation15]  }
 0x3be   : > { %s801_s9 = sshll.u32 %s1444_s30, 4  ;;  %s803_s24 = sshll.u32 %s1686_s8, 4  ;;  %s802_s9 = int_to_ptr.vmem [resolvable:$true] %s801_s9  ;;  %s804_s24 = int_to_ptr.hbm [resolvable:$true] %s803_s24 }
 0x3bf   : > { %s1445_s25 = smov 128   ;;  %s1446_s15 = smov 8  }
 0x3c0   : > { %1110 = dma.vmem_to_hbm [thread:$0]  (%p1139_p4), %s802_s9, 256, %s804_s24, [#allocation8], %s1445_s25, %s1445_s25, %s1446_s15  }
 0x3c1   : > { %1418 = dma.done.wait (%p1139_p4), [#allocation8], 256  }
 0x3c2   : > { %1420 = vsyncadd (%p1139_p4), [#allocation8], 4294967040 }
 0x3c3 PF: > { %p29_p5 = scmp.ge.s32.totalorder %s1572_s22, 6   ;;  %s1693_s9 = smov %s1427_s10 }
 0x3c4   : > { %s1694_s10 = smov %s1431_s11  ;;  %s1695_s11 = smov %s1583_s28 }
 0x3c5   : > { %s1696_s12 = smov %s1572_s22  ;;  %31 = sbr.rel (!%p29_p5) target bundleno = 12 (0xc), region = 110 }
 0x3ca   :  { %820 = vsyncpa [#allocation7], 1 }
 0x3cb   :  { %822 = vsyncpa [#allocation7 + $0x1], 1 }
 0x3cc   :  { %823 = vsyncpa [#allocation10], 1 }
 0x3cd   :  { %824 = vsyncpa [#allocation13], 1 }
 0x3ce   :  { %826 = vsyncpa [#allocation13 + $0x1], 1 }
 0x3cf   :  { %827 = vsyncpa [#allocation8], 1 }
 0x3d0   :  { %829 = vsyncpa [#allocation8 + $0x1], 1 }

</bundles_post_ra>
